<compile_context>
chip_gen: v5e
topology: v5e:2x2
jax: 0.10.0
libtpu: 0.0.40
codegen_flags: <defaults>
</compile_context>

<pallas_src>
from __future__ import annotations

import functools
from typing import Any

import jax
import jax.numpy as jnp
import numpy as np
from jax.experimental import pallas as pl
from jax.experimental.pallas import tpu as pltpu

# dxtb narrows integer leaves to int8 (DEFAULT_BASIS_INT).
DEFAULT_BASIS_INT = jnp.int8
_INT8_MIN, _INT8_MAX = -128, 127

# Cap one block at 512 K elements (2 MiB for f32).  Double-buffered in+out
# (f32 in, <=f32 out) stays <= ~8 MiB — safe on v5e/v6e (128 MiB physical
# VMEM) and v7x (64 MiB physical / 32 MiB default scoped).
_MAX_BLOCK_ELEMS = 4096 * 128

# Counts actual Pallas kernel launches (used by the demo sanity check).
_KERNEL_LAUNCHES = 0


# ----------------------------------------------------------------------------
# Pallas kernel: elementwise copy + dtype cast of one (block_rows, lane) block
# ----------------------------------------------------------------------------
def _copy_cast_kernel(x_ref, o_ref):
    o_ref[...] = x_ref[...].astype(o_ref.dtype)


def _sublane_multiple(dtype) -> int:
    # Native packed-tile sublane count: f32 -> 8, bf16/f16 -> 16, int8 -> 32.
    itemsize = jnp.dtype(dtype).itemsize
    return max(8, 32 // max(1, itemsize))


def _next_pow2(x: int) -> int:
    return 1 << (x - 1).bit_length() if x > 1 else 1


def _choose_lane(n_elems: int) -> int:
    # Lane-dense output is the biggest single BlockSpec lever; widen the lane
    # dimension for large slabs while keeping >= 16 rows at that width.
    for lane in (1024, 512, 256):
        if n_elems >= lane * 16:
            return lane
    return 128


def _slab_geometry(n_elems: int, in_dtype, out_dtype):
    lane = _choose_lane(n_elems)
    sub = max(_sublane_multiple(in_dtype), _sublane_multiple(out_dtype))
    rows = max(sub, -(-n_elems // lane))          # ceil(n / lane), >= sublane tile
    rows = _next_pow2(rows)                       # bucket for compile-cache reuse
    max_block_rows = max(sub, _MAX_BLOCK_ELEMS // lane)
    block_rows = min(rows, max_block_rows)        # both powers of two -> divides
    return lane, rows, block_rows


@functools.lru_cache(maxsize=None)
def _build_copy_cast(rows: int, lane: int, block_rows: int,
                     in_dtype_name: str, out_dtype_name: str):
    """Cached builder: one jitted pallas_call per bucketed geometry + dtypes."""
    out_dtype = jnp.dtype(out_dtype_name)
    grid = (rows // block_rows,)
    call = pl.pallas_call(
        _copy_cast_kernel,
        out_shape=jax.ShapeDtypeStruct((rows, lane), out_dtype),
        grid=grid,
        in_specs=[pl.BlockSpec((block_rows, lane), lambda i: (i, 0))],
        out_specs=pl.BlockSpec((block_rows, lane), lambda i: (i, 0)),
        compiler_params=pltpu.CompilerParams(
            # "parallel" lets v7x's 2 TCs split the grid when it has >=2 steps;
            # harmless no-op for grid=(1,).
            dimension_semantics=("parallel",),
            # Explicit cap: safe on v7x (64 MiB physical) and raises v5e's
            # 16 MiB default scoped limit so larger blocks stay legal.
            vmem_limit_bytes=32 * 1024 * 1024,
        ),
    )
    return jax.jit(call)


def _materialize_slab(values_np: np.ndarray, out_dtype) -> jnp.ndarray:
    """Materialize a flat host array on device, casting via Pallas if needed."""
    global _KERNEL_LAUNCHES
    n = int(values_np.shape[0])
    out_dtype = jnp.dtype(out_dtype)
    if n == 0:
        return jnp.zeros((0,), dtype=out_dtype)

    in_dtype = values_np.dtype
    if jnp.dtype(in_dtype) == out_dtype:
        # No cast needed: plain device transfer, no kernel, no HBM round trip.
        return jnp.asarray(values_np)

    lane, rows, block_rows = _slab_geometry(n, in_dtype, out_dtype)
    # Host-side zero padding (no device-side alloc + dynamic-update-slice).
    padded = np.zeros((rows * lane,), dtype=in_dtype)
    padded[:n] = values_np
    padded = padded.reshape(rows, lane)
    fn = _build_copy_cast(rows, lane, block_rows,
                          np.dtype(in_dtype).name, out_dtype.name)
    out = fn(jnp.asarray(padded))
    _KERNEL_LAUNCHES += 1
    return out.reshape(-1)[:n]


# ----------------------------------------------------------------------------
# Module-tree node types (JAX analogues of ParameterModule / NonNumericValue)
# ----------------------------------------------------------------------------
class ParameterModule:
    """Numeric leaf holding a materialized jnp array."""

    def __init__(self, param: jnp.ndarray, scalar: bool):
        self.param = param
        self._scalar = scalar

    @property
    def is_scalar(self) -> bool:
        return self._scalar

    def __repr__(self) -> str:
        return f"ParameterModule(shape={self.param.shape}, dtype={self.param.dtype})"


class NonNumericValue:
    """Wrapper for non-numeric values (strings, mixed lists, ...)."""

    def __init__(self, value: Any):
        self.value = value

    def __repr__(self) -> str:
        return f"NonNumericValue({self.value!r})"


# ----------------------------------------------------------------------------
# Leaf collection (phase 1) and fill (phase 2)
# ----------------------------------------------------------------------------
def _is_float(v: Any) -> bool:
    return isinstance(v, float) and not isinstance(v, bool)


def _is_integer(v: Any) -> bool:
    return isinstance(v, int) and not isinstance(v, bool)


def _is_int_list(v: list) -> bool:
    return len(v) > 0 and all(_is_integer(x) for x in v)


def _is_float_list(v: list) -> bool:
    return len(v) > 0 and all(_is_float(x) for x in v)


class _LeafRef:
    """Placeholder pointing into one of the batched slabs."""

    __slots__ = ("kind", "offset", "length", "scalar")

    def __init__(self, kind: str, offset: int, length: int, scalar: bool):
        self.kind = kind
        self.offset = offset
        self.length = length
        self.scalar = scalar


class _Collector:
    def __init__(self):
        self.float_vals: list[float] = []
        self.int_vals: list[int] = []

    def add_float(self, values, scalar: bool) -> _LeafRef:
        vals = [values] if scalar else list(values)
        off = len(self.float_vals)
        self.float_vals.extend(float(v) for v in vals)
        return _LeafRef("float", off, len(vals), scalar)

    def add_int(self, values, scalar: bool) -> _LeafRef:
        vals = [values] if scalar else list(values)
        for v in vals:
            if not (_INT8_MIN <= int(v) <= _INT8_MAX):
                raise ValueError(
                    f"Integer parameter {v} does not fit the int8 leaf dtype "
                    f"(dxtb DEFAULT_BASIS_INT); would silently wrap."
                )
        off = len(self.int_vals)
        self.int_vals.extend(int(v) for v in vals)
        return _LeafRef("int", off, len(vals), scalar)


def _collect(value: Any, coll: _Collector) -> Any:
    """Build the structural tree with _LeafRef placeholders, mirroring _convert."""
    if isinstance(value, dict):
        return {k: _collect(v, coll) for k, v in value.items()}
    if isinstance(value, list):
        is_int_l = _is_int_list(value)
        is_float_l = _is_float_list(value)
        if value and (is_int_l or is_float_l):
            if is_float_l:
                return coll.add_float(value, scalar=False)
            return coll.add_int(value, scalar=False)
        converted = [_collect(item, coll) for item in value]
        all_modules = all(
            isinstance(c, (dict, list, _LeafRef, NonNumericValue)) for c in converted
        )
        if all_modules:
            return converted
        return NonNumericValue(converted)
    if _is_float(value):
        return coll.add_float(value, scalar=True)
    if _is_integer(value):
        return coll.add_int(value, scalar=True)
    return NonNumericValue(value)


def _fill(node: Any, slabs: dict) -> Any:
    """Replace _LeafRef placeholders with ParameterModule slices of the slabs."""
    if isinstance(node, dict):
        return {k: _fill(v, slabs) for k, v in node.items()}
    if isinstance(node, list):
        return [_fill(v, slabs) for v in node]
    if isinstance(node, _LeafRef):
        flat = slabs[node.kind]
        arr = flat[node.offset : node.offset + node.length]
        if node.scalar:
            arr = arr.reshape(())
        return ParameterModule(arr, node.scalar)
    if isinstance(node, NonNumericValue):
        v = node.value
        if isinstance(v, (dict, list)):
            return NonNumericValue(_fill(v, slabs))
        return node
    return node


def _revert(module: Any) -> Any:
    if isinstance(module, dict):
        return {k: _revert(v) for k, v in module.items()}
    if isinstance(module, list):
        return [_revert(v) for v in module]
    if isinstance(module, ParameterModule):
        p = module.param
        if jnp.issubdtype(p.dtype, jnp.floating):
            host = np.asarray(p, dtype=np.float64)
        else:
            host = np.asarray(p, dtype=np.int64)
        if host.ndim == 0:
            return host.item()
        return host.tolist()
    if isinstance(module, NonNumericValue):
        v = module.value
        if isinstance(v, (dict, list, ParameterModule, NonNumericValue)):
            return _revert(v)
        return v
    return module


# ----------------------------------------------------------------------------
# ParamModule
# ----------------------------------------------------------------------------
class ParamModule:
    """JAX/Pallas analogue of dxtb's ParamModule (batched leaf materialization)."""

    def __init__(self, par: dict, dtype=jnp.float32):
        dtype = jnp.dtype(dtype)
        if dtype == jnp.dtype(jnp.float64):
            # Host staging is float32 and TPU Pallas f64 support is limited;
            # reject instead of silently losing precision.
            raise ValueError("float64 parameter dtype is not supported on TPU.")
        self._dtype = dtype

        # Phase 1: walk the dict once, gather every numeric value into two
        # flat host buffers (float / int) and build the structural skeleton.
        coll = _Collector()
        skeleton = _collect(par, coll)

        # Phase 2: at most ONE pallas_call (float slab, only if a cast to a
        # non-f32 dtype is needed).  The int slab is already int8 on the host
        # (range-checked), so it is a pure device_put — no kernel.
        # TODO(synk): bf16/f16 targets are double-rounded (f64 -> f32 host
        # staging -> target in-kernel); benign for parameter magnitudes.
        float_flat = _materialize_slab(
            np.asarray(coll.float_vals, dtype=np.float32), dtype
        )
        int_flat = _materialize_slab(
            np.asarray(coll.int_vals, dtype=np.int8), DEFAULT_BASIS_INT
        )

        # Phase 3: slice per-leaf views out of the slabs.
        self.parameter_tree = _fill(skeleton, {"float": float_flat, "int": int_flat})
        self.dummy = jnp.empty((0,), dtype=dtype)

    @property
    def dtype(self):
        return self._dtype

    def forward(self):
        """Returns the internal parameter tree (same as the PyTorch forward)."""
        return self.parameter_tree

    def __call__(self):
        return self.forward()

    def to_dict(self) -> dict:
        return _revert(self.parameter_tree)

    # TODO(synk): to_pydantic / to_*_file need Pydantic + file I/O; no Pallas equivalent.


# ----------------------------------------------------------------------------
# Demo
# ----------------------------------------------------------------------------
def _collect_leaves(tree, out):
    if isinstance(tree, dict):
        for v in tree.values():
            _collect_leaves(v, out)
    elif isinstance(tree, list):
        for v in tree:
            _collect_leaves(v, out)
    elif isinstance(tree, ParameterModule):
        out.append(tree.param)
    elif isinstance(tree, NonNumericValue) and isinstance(tree.value, (dict, list)):
        _collect_leaves(tree.value, out)


def _check(a, b, rtol, atol):
    if isinstance(a, dict):
        assert set(a) == set(b)
        for k in a:
            _check(a[k], b[k], rtol, atol)
    elif isinstance(a, list) and a and all(isinstance(x, float) for x in a):
        np.testing.assert_allclose(np.asarray(a), np.asarray(b), rtol=rtol, atol=atol)
    elif isinstance(a, list):
        assert len(a) == len(b)
        for x, y in zip(a, b):
            _check(x, y, rtol, atol)
    elif isinstance(a, float):
        np.testing.assert_allclose(a, b, rtol=rtol, atol=atol)
    else:
        assert a == b, (a, b)


if __name__ == "__main__":
    key = jax.random.PRNGKey(0)
    rand_floats = [float(x) for x in np.asarray(jax.random.normal(key, (32,)))]

    # Synthetic "Param" (Pydantic-dump-like) dictionary with numeric lists,
    # scalars, strings, and nested structure — mirrors a tiny xTB parametrization.
    par = {
        "meta": {"name": "GFN1-xTB", "version": 1, "reference": "JCTC 2017"},
        "element": {
            "H": {
                "shells": ["1s"],
                "levels": [-10.923452, -2.171902],
                "ngauss": [4, 4],
                "refocc": [1.0, 0.0],
                "gam": 0.470099,
            },
            "C": {
                "shells": ["2s", "2p"],
                "levels": [-13.970922, -10.063292],
                "ngauss": [4, 4],
                "refocc": [2.0, 2.0],
                "gam": 0.479988,
            },
        },
        "hamiltonian": {
            "xtb": {
                "kpol": 2.85,
                "enscale": -0.007,
                "shell": {"ss": 1.85, "pp": 2.23, "sp": 2.04},
                "wexp": 0,
            }
        },
        "calibration": {"random_floats": rand_floats},
    }

    # ------------------------------------------------------------------
    # 1) float32 target: no-cast fast path (no kernel launch), exact-ish
    #    round trip.
    # ------------------------------------------------------------------
    module_f32 = ParamModule(par, dtype=jnp.float32)
    tree_f32 = module_f32()
    leaves_f32 = []
    _collect_leaves(tree_f32, leaves_f32)
    for leaf in leaves_f32:
        jax.block_until_ready(leaf)
    assert any(l.dtype == jnp.float32 for l in leaves_f32)
    assert any(l.dtype == jnp.int8 for l in leaves_f32)
    _check(par, module_f32.to_dict(), rtol=1e-6, atol=1e-6)

    # ------------------------------------------------------------------
    # 2) bfloat16 target: exercises the Pallas copy/cast kernel (f32 -> bf16
    #    on the batched lane-dense float slab).
    # ------------------------------------------------------------------
    module_bf16 = ParamModule(par, dtype=jnp.bfloat16)
    tree_bf16 = module_bf16()
    leaves_bf16 = []
    _collect_leaves(tree_bf16, leaves_bf16)
    for leaf in leaves_bf16:
        jax.block_until_ready(leaf)
    assert any(l.dtype == jnp.bfloat16 for l in leaves_bf16)
    assert any(l.dtype == jnp.int8 for l in leaves_bf16)
    assert _KERNEL_LAUNCHES >= 1  # the cast kernel actually ran
    _check(par, module_bf16.to_dict(), rtol=1e-2, atol=1e-2)

    print("KERNEL_OK")
</pallas_src>

<mosaic_0001>
module attributes {stable_mosaic.version = 11 : i64} {
  func.func @_copy_cast_kernel(%arg0: i32, %arg1: memref<16x128xf32, #tpu.memory_space<vmem>>, %arg2: memref<16x128xbf16, #tpu.memory_space<vmem>>) attributes {dimension_semantics = [#tpu.dimension_semantics<parallel>], iteration_bounds = array<i64: 1>, scalar_prefetch = 0 : i64, scratch_operands = 0 : i64, tpu.core_type = #tpu.core_type<tc>, window_params = [{transform_indices = @transform_0, window_bounds = array<i64: 16, 128>}, {transform_indices = @transform_1, window_bounds = array<i64: 16, 128>}]} {
    %c0 = arith.constant 0 : index
    %c0_0 = arith.constant 0 : index
    %0 = vector.load %arg1[%c0, %c0_0] : memref<16x128xf32, #tpu.memory_space<vmem>>, vector<16x128xf32>
    %1 = arith.truncf %0 : vector<16x128xf32> to vector<16x128xbf16>
    %c0_1 = arith.constant 0 : index
    %c0_2 = arith.constant 0 : index
    %2 = vector.load %arg2[%c0_1, %c0_2] : memref<16x128xbf16, #tpu.memory_space<vmem>>, vector<16x128xbf16>
    tpu.vector_store %arg2[%c0_1, %c0_2], %1 {strides = array<i32>} : memref<16x128xbf16, #tpu.memory_space<vmem>>, vector<16x128xbf16>,
    return
  }
  func.func @transform_0(%arg0: i32) -> (i32, i32) {
    %c0_i32 = arith.constant 0 : i32
    %c0_i32_0 = arith.constant 0 : i32
    return %arg0, %c0_i32 : i32, i32
  }
  func.func @transform_1(%arg0: i32) -> (i32, i32) {
    %c0_i32 = arith.constant 0 : i32
    %c0_i32_0 = arith.constant 0 : i32
    return %arg0, %c0_i32 : i32, i32
  }
}

</mosaic_0001>

<bundles_post_ra>
// kernel: tpu_custom_call.1
= control target key start
LH: loop header
LB: loop body
LE: loop exit
PB: predicated region body
PF: predicated region fallthrough
CT: control target
= control target key end

     0   :  { %6 = vsyncpa [#allocation3], 0  ;;  %s135_s0 = inlined_call_operand.hbm [shape: f32[16,128], index: 0, kind: input, shape index: {}]   ;;  %s136_s1 = inlined_call_operand.hbm [shape: bf16[16,128], index: 1, kind: output, shape index: {}]  }
   0x1   :  { %7 = vsyncpa [#allocation4], 0  ;;  %s12_s8 = sshll.u32 %s135_s0, 4  ;;  %s113_s9 = smov [#allocation2]   ;;  %s13_s8 = int_to_ptr.hbm [resolvable:$true] %s12_s8 }
   0x2   :  { %s14_s10 = sshll.u32 %s113_s9, 4  ;;  %s114_s11 = smov 128   ;;  %s15_s10 = int_to_ptr.vmem [resolvable:$true] %s14_s10 }
   0x3   :  { %s115_s12 = smov 8  }
   0x4   :  { %20 = dma.hbm_to_vmem [thread:$0]  %s13_s8, 256, %s15_s10, [#allocation3], %s114_s11, %s114_s11, %s115_s12  }
   0x5   :  { %109 = dma.done.wait [#allocation3], 256  }
   0x6   :  { %110 = vsyncadd [#allocation3], 4294967040  ;;  %s116_s13 = smov [#allocation5]   ;;  %s37_s17 = sshll.u32 %s136_s1, 4  ;;  %v25_v0 = vld [vmem:[#allocation2] sm:$0xff]  ;;  %v26_v1 = vld [vmem:[#allocation2 + $0x8] sm:$0xff]  ;;  %s38_s17 = int_to_ptr.hbm [resolvable:$true] %s37_s17 }
   0x7   :  { %s35_s14 = sshll.u32 %s116_s13, 4  ;;  %v53_v2 = vpack.c.bf16 %v26_v1, %v25_v0  ;;  %s117_s0 = smov 64   ;;  %s36_s14 = int_to_ptr.vmem [resolvable:$true] %s35_s14 }
   0x8   :  { %s118_s18 = smov 4  }
   0x9   :  { %54 = vst [vmem:[#allocation5] sm:$0xff] %v53_v2  }
   0xa   :  { %43 = dma.vmem_to_hbm [thread:$0]  %s36_s14, 128, %s38_s17, [#allocation4], %s117_s0, %s117_s0, %s118_s18  }
   0xb   :  { %111 = dma.done.wait [#allocation4], 128  }
   0xc   :  { %112 = vsyncadd [#allocation4], 4294967168 }
   0xd   :  { %48 = vsyncpa [#allocation3], 1 }
   0xe   :  { %49 = vsyncpa [#allocation4], 1 }

</bundles_post_ra>
